<compile_context>
chip_gen: v7x
topology: tpu7x:2x2x1
jax: 0.10.0
libtpu: 0.0.40
codegen_flags: <defaults>
</compile_context>

<pallas_src>
import functools

import jax
import jax.numpy as jnp
from jax.experimental import pallas as pl
from jax.experimental.pallas import tpu as pltpu

_LANES = 128
_DEFAULT_TILE_BATCH = 2048   # sweep 2048-8192 for very large B


def _round_up(v, m):
    return -(-v // m) * m


def _mish(x, approx_recip):
    # Mish(x) = x * tanh(softplus(x)).
    # With s = 1 + exp(x):  tanh(log(s)) = (s^2 - 1) / (s^2 + 1)
    # -> one EUP exp + one reciprocal instead of exp + log1p + tanh.
    # Clamping the exp argument at 20 is exact in f32 (ratio rounds to 1.0).
    e = jnp.exp(jnp.minimum(x, 20.0))
    s = 1.0 + e
    s2 = s * s
    num = s2 - 1.0
    den = s2 + 1.0
    if approx_recip:
        return x * (num * pl.reciprocal(den, approx=True))   # EUP slot has slack
    return x * (num / den)                                    # precise VPU divide


def value_kernel(x_ref, w1_ref, w23_ref, b123_ref, w4t_ref, b4_ref, o_ref,
                 *, approx_recip):
    f32 = jnp.float32
    x = x_ref[...].astype(w1_ref.dtype)                      # bf16 path by default
    h = jnp.dot(x, w1_ref[...], preferred_element_type=f32) + b123_ref[0:1, :]
    h = _mish(h, approx_recip)
    h = jnp.dot(h.astype(w23_ref.dtype), w23_ref[0],
                preferred_element_type=f32) + b123_ref[1:2, :]
    h = _mish(h, approx_recip)
    h = jnp.dot(h.astype(w23_ref.dtype), w23_ref[1],
                preferred_element_type=f32) + b123_ref[2:3, :]
    h = _mish(h, approx_recip)
    # Final (Hp -> 1) layer in transposed form so the tile result is one
    # lane-dense (1, tb) row: aligned (tb, Hp) -> (Hp, tb) transpose (XLU slot
    # has slack) feeding an (8, Hp) @ (Hp, tb) MXU matmul whose rows 1..7 are
    # zero.  This removes the 128x zero-padded HBM writeback entirely.
    ht = h.astype(w4t_ref.dtype).T                            # (Hp, tb)
    out = jnp.dot(w4t_ref[...], ht, preferred_element_type=f32)  # (8, tb)
    o_ref[...] = (out[0:1, :] + b4_ref[0, 0]).astype(o_ref.dtype)


def pack_params(p, *, matmul_dtype=jnp.bfloat16):
    """Pack the 8 Linear tensors into 5 arrays, zero-pad the hidden dim to a
    multiple of 128 lanes (exact: mish(0)=0), and store w4 transposed so the
    kernel can emit a lane-dense output row."""
    S, H = p["w1"].shape
    assert p["w2"].shape == (H, H) and p["w3"].shape == (H, H), "layer widths differ"
    assert p["w4"].shape == (H, 1) and p["b4"].shape == (1, 1)
    for name in ("b1", "b2", "b3"):
        assert p[name].shape == (1, H), "bias width mismatch"

    Hp = _round_up(H, _LANES)
    pad_c = lambda a: jnp.pad(a, ((0, 0), (0, Hp - a.shape[1])))
    pad_rc = lambda a: jnp.pad(a, ((0, Hp - a.shape[0]), (0, Hp - a.shape[1])))

    w1 = pad_c(p["w1"]).astype(matmul_dtype)                              # (S, Hp)
    w23 = jnp.stack([pad_rc(p["w2"]), pad_rc(p["w3"])]).astype(matmul_dtype)  # (2,Hp,Hp)
    b123 = jnp.concatenate([pad_c(p["b1"]), pad_c(p["b2"]), pad_c(p["b3"])],
                           0).astype(jnp.float32)                         # (3, Hp)
    w4t = jnp.zeros((8, Hp), jnp.float32).at[0, :H].set(
        p["w4"][:, 0]).astype(matmul_dtype)                               # (8, Hp)
    b4 = p["b4"].reshape(1, 1).astype(jnp.float32)                        # SMEM scalar
    return {"w1": w1, "w23": w23, "b123": b123, "w4t": w4t, "b4": b4}


def value_forward(x, packed, *, tile_batch=None, approx_recip=True):
    """x: (B, state_dim) f32; packed: output of pack_params(). Returns (B, 1)."""
    B, S = x.shape
    w1, w23, b123, w4t, b4 = (packed["w1"], packed["w23"], packed["b123"],
                              packed["w4t"], packed["b4"])
    assert w1.shape[0] == S, (w1.shape, S)
    Hp = w1.shape[1]

    # Batch tiling: multiples of 128 keep the in-kernel transpose and the
    # packed (1, tb) output row lane-aligned.  Large default tile amortizes
    # per-grid-step overhead; force >= 2 steps when B >= 256 so both v7x
    # TensorCores get work (no effect on single-TC v5e/v6e).
    if tile_batch is None:
        tile_batch = _DEFAULT_TILE_BATCH
    B128 = _round_up(B, _LANES)
    tb = _round_up(min(tile_batch, B128), _LANES)
    if B128 // tb < 2 and B128 >= 2 * _LANES:
        tb = _round_up(-(-B128 // 2), _LANES)
    B_pad = _round_up(B, tb)
    grid = B_pad // tb

    x_pad = jnp.pad(x, ((0, B_pad - B), (0, 0))) if B_pad != B else x

    def const(a):  # whole array, same block every step -> stays VMEM-resident
        return pl.BlockSpec(a.shape, lambda i, _nd=a.ndim: (0,) * _nd)

    # VMEM budget (v7x: 64 MiB physical / 32 MiB scoped default).
    weight_bytes = sum(int(a.size) * a.dtype.itemsize for a in (w1, w23, b123, w4t))
    est_vmem = (2 * weight_bytes                  # default double-buffered residents
                + 6 * tb * Hp * 4                 # live f32 activation temporaries
                + 2 * tb * S * 4 + 2 * tb * 4)    # double-buffered x / out tiles
    compiler_kwargs = dict(dimension_semantics=("parallel",))
    if est_vmem > 12 * 2**20:
        compiler_kwargs["vmem_limit_bytes"] = int(
            min(max(est_vmem, 32 * 2**20), 64 * 2**20))

    kernel = functools.partial(value_kernel, approx_recip=approx_recip)

    out = pl.pallas_call(
        kernel,
        out_shape=jax.ShapeDtypeStruct((1, B_pad), jnp.float32),
        grid_spec=pltpu.PrefetchScalarGridSpec(
            num_scalar_prefetch=0,
            grid=(grid,),
            in_specs=[
                pl.BlockSpec((tb, S), lambda i: (i, 0)),            # x: batch-tiled
                const(w1), const(w23), const(b123), const(w4t),     # resident weights
                pl.BlockSpec(memory_space=pltpu.MemorySpace.SMEM),  # b4 scalar
            ],
            out_specs=pl.BlockSpec((1, tb), lambda i: (0, i)),      # lane-dense row
        ),
        compiler_params=pltpu.CompilerParams(**compiler_kwargs),
    )(x_pad, w1, w23, b123, w4t, b4)

    return out[0, :B].reshape(B, 1)


def init_params(key, state_dim, hidden_dim):
    """PyTorch-Linear-style U(-1/sqrt(fan_in), +...) init; weights stored as
    (in_features, out_features) so the model computes x @ W + b."""
    dims = [(state_dim, hidden_dim), (hidden_dim, hidden_dim),
            (hidden_dim, hidden_dim), (hidden_dim, 1)]
    params = {}
    keys = jax.random.split(key, 2 * len(dims))
    for i, (fan_in, fan_out) in enumerate(dims):
        bound = 1.0 / jnp.sqrt(float(fan_in))
        params[f"w{i + 1}"] = jax.random.uniform(
            keys[2 * i], (fan_in, fan_out), jnp.float32, -bound, bound)
        params[f"b{i + 1}"] = jax.random.uniform(
            keys[2 * i + 1], (1, fan_out), jnp.float32, -bound, bound)
    return params


def value_reference(x, p):
    h = x
    for i in range(1, 4):
        h = h @ p[f"w{i}"] + p[f"b{i}"]
        h = h * jnp.tanh(jax.nn.softplus(h))
    return h @ p["w4"] + p["b4"]


if __name__ == "__main__":
    batch = 200          # pads to 256 rows -> exercises batch padding
    state_dim = 16
    hidden_dim = 32      # padded to 128 lanes inside pack_params

    key = jax.random.PRNGKey(0)
    k_x, k_p = jax.random.split(key)
    x = jax.random.normal(k_x, (batch, state_dim), dtype=jnp.float32)
    params = init_params(k_p, state_dim, hidden_dim)
    ref = value_reference(x, params)

    # Fast default path: bf16 matmul operands + EUP approx-reciprocal Mish.
    # tile_batch=128 forces a 2-step batch grid even at this tiny size so the
    # pipelined index maps / resident weight blocks actually get exercised.
    out_fast = value_forward(x, pack_params(params), tile_batch=128)
    out_fast = jax.block_until_ready(out_fast)
    assert out_fast.shape == (batch, 1), out_fast.shape
    assert jnp.allclose(out_fast, ref, atol=5e-2, rtol=5e-2), (
        "bf16 path max err", float(jnp.max(jnp.abs(out_fast - ref))))

    # High-precision path: f32 operands + exact divide; default tile selection
    # (still splits into >= 2 grid steps for megacore).
    out_exact = value_forward(x, pack_params(params, matmul_dtype=jnp.float32),
                              approx_recip=False)
    out_exact = jax.block_until_ready(out_exact)
    assert out_exact.shape == (batch, 1), out_exact.shape
    assert jnp.allclose(out_exact, ref, atol=1e-4, rtol=1e-4), (
        "f32 path max err", float(jnp.max(jnp.abs(out_exact - ref))))

    print("KERNEL_OK")
</pallas_src>

<mosaic_0001>
module attributes {stable_mosaic.version = 11 : i64} {
  func.func @value_kernel(%arg0: i32, %arg1: memref<128x16xf32, #tpu.memory_space<vmem>>, %arg2: memref<16x128xbf16, #tpu.memory_space<vmem>>, %arg3: memref<2x128x128xbf16, #tpu.memory_space<vmem>>, %arg4: memref<3x128xf32, #tpu.memory_space<vmem>>, %arg5: memref<8x128xbf16, #tpu.memory_space<vmem>>, %arg6: memref<1x1xf32, #tpu.memory_space<smem>>, %arg7: memref<1x128xf32, #tpu.memory_space<vmem>>) attributes {dimension_semantics = [#tpu.dimension_semantics<parallel>], iteration_bounds = array<i64: 2>, scalar_prefetch = 0 : i64, scratch_operands = 0 : i64, tpu.core_type = #tpu.core_type<tc>, window_params = [{transform_indices = @transform_0, window_bounds = array<i64: 128, 16>}, {pipeline_mode = #tpu.pipeline_mode<synchronous>, transform_indices = @transform_1, window_bounds = array<i64: 16, 128>}, {pipeline_mode = #tpu.pipeline_mode<synchronous>, transform_indices = @transform_2, window_bounds = array<i64: 2, 128, 128>}, {pipeline_mode = #tpu.pipeline_mode<synchronous>, transform_indices = @transform_3, window_bounds = array<i64: 3, 128>}, {pipeline_mode = #tpu.pipeline_mode<synchronous>, transform_indices = @transform_4, window_bounds = array<i64: 8, 128>}, {transform_indices = @transform_5, window_bounds = array<i64: 1, 1>}, {transform_indices = @transform_6, window_bounds = array<i64: 1, 128>}]} {
    %c0 = arith.constant 0 : index
    %c0_0 = arith.constant 0 : index
    %0 = vector.load %arg1[%c0, %c0_0] : memref<128x16xf32, #tpu.memory_space<vmem>>, vector<128x16xf32>
    %1 = arith.truncf %0 : vector<128x16xf32> to vector<128x16xbf16>
    %c0_1 = arith.constant 0 : index
    %c0_2 = arith.constant 0 : index
    %2 = vector.load %arg2[%c0_1, %c0_2] : memref<16x128xbf16, #tpu.memory_space<vmem>>, vector<16x128xbf16>
    %cst = arith.constant dense<0.000000e+00> : vector<128x128xf32>
    %3 = tpu.matmul %1, %2, %cst {dimension_numbers = #tpu.dot_dimension_numbers<[1], [0], [0], [1], [0, 0, 1, 1], [], []>} : vector<128x16xbf16>, vector<16x128xbf16>, vector<128x128xf32> -> vector<128x128xf32>
    %c0_3 = arith.constant 0 : index
    %c0_4 = arith.constant 0 : index
    %4 = vector.load %arg4[%c0_3, %c0_4] : memref<3x128xf32, #tpu.memory_space<vmem>>, vector<1x128xf32>
    %5 = vector.broadcast %4 : vector<1x128xf32> to vector<128x128xf32>
    %6 = arith.addf %3, %5 : vector<128x128xf32>
    %cst_5 = arith.constant 2.000000e+01 : f32
    %7 = vector.broadcast %cst_5 : f32 to vector<128x128xf32>
    %8 = arith.minimumf %6, %7 : vector<128x128xf32>
    %9 = math.exp %8 : vector<128x128xf32>
    %cst_6 = arith.constant 1.000000e+00 : f32
    %10 = vector.broadcast %cst_6 : f32 to vector<128x128xf32>
    %11 = arith.addf %10, %9 : vector<128x128xf32>
    %12 = arith.mulf %11, %11 : vector<128x128xf32>
    %cst_7 = arith.constant 1.000000e+00 : f32
    %13 = vector.broadcast %cst_7 : f32 to vector<128x128xf32>
    %14 = arith.subf %12, %13 : vector<128x128xf32>
    %cst_8 = arith.constant 1.000000e+00 : f32
    %15 = vector.broadcast %cst_8 : f32 to vector<128x128xf32>
    %16 = arith.addf %12, %15 : vector<128x128xf32>
    %17 = tpu.reciprocal %16 {approx = true} : vector<128x128xf32> -> vector<128x128xf32>
    %18 = arith.mulf %14, %17 : vector<128x128xf32>
    %19 = arith.mulf %6, %18 : vector<128x128xf32>
    %20 = arith.truncf %19 : vector<128x128xf32> to vector<128x128xbf16>
    %c0_9 = arith.constant 0 : index
    %c0_10 = arith.constant 0 : index
    %c0_11 = arith.constant 0 : index
    %21 = vector.load %arg3[%c0_9, %c0_10, %c0_11] : memref<2x128x128xbf16, #tpu.memory_space<vmem>>, vector<1x128x128xbf16>
    %22 = vector.shape_cast %21 : vector<1x128x128xbf16> to vector<128x128xbf16>
    %cst_12 = arith.constant dense<0.000000e+00> : vector<128x128xf32>
    %23 = tpu.matmul %20, %22, %cst_12 {dimension_numbers = #tpu.dot_dimension_numbers<[1], [0], [0], [1], [0, 0, 1, 1], [], []>} : vector<128x128xbf16>, vector<128x128xbf16>, vector<128x128xf32> -> vector<128x128xf32>
    %c1 = arith.constant 1 : index
    %c0_13 = arith.constant 0 : index
    %24 = vector.load %arg4[%c1, %c0_13] : memref<3x128xf32, #tpu.memory_space<vmem>>, vector<1x128xf32>
    %25 = vector.broadcast %24 : vector<1x128xf32> to vector<128x128xf32>
    %26 = arith.addf %23, %25 : vector<128x128xf32>
    %cst_14 = arith.constant 2.000000e+01 : f32
    %27 = vector.broadcast %cst_14 : f32 to vector<128x128xf32>
    %28 = arith.minimumf %26, %27 : vector<128x128xf32>
    %29 = math.exp %28 : vector<128x128xf32>
    %cst_15 = arith.constant 1.000000e+00 : f32
    %30 = vector.broadcast %cst_15 : f32 to vector<128x128xf32>
    %31 = arith.addf %30, %29 : vector<128x128xf32>
    %32 = arith.mulf %31, %31 : vector<128x128xf32>
    %cst_16 = arith.constant 1.000000e+00 : f32
    %33 = vector.broadcast %cst_16 : f32 to vector<128x128xf32>
    %34 = arith.subf %32, %33 : vector<128x128xf32>
    %cst_17 = arith.constant 1.000000e+00 : f32
    %35 = vector.broadcast %cst_17 : f32 to vector<128x128xf32>
    %36 = arith.addf %32, %35 : vector<128x128xf32>
    %37 = tpu.reciprocal %36 {approx = true} : vector<128x128xf32> -> vector<128x128xf32>
    %38 = arith.mulf %34, %37 : vector<128x128xf32>
    %39 = arith.mulf %26, %38 : vector<128x128xf32>
    %40 = arith.truncf %39 : vector<128x128xf32> to vector<128x128xbf16>
    %c1_18 = arith.constant 1 : index
    %c0_19 = arith.constant 0 : index
    %c0_20 = arith.constant 0 : index
    %41 = vector.load %arg3[%c1_18, %c0_19, %c0_20] : memref<2x128x128xbf16, #tpu.memory_space<vmem>>, vector<1x128x128xbf16>
    %42 = vector.shape_cast %41 : vector<1x128x128xbf16> to vector<128x128xbf16>
    %cst_21 = arith.constant dense<0.000000e+00> : vector<128x128xf32>
    %43 = tpu.matmul %40, %42, %cst_21 {dimension_numbers = #tpu.dot_dimension_numbers<[1], [0], [0], [1], [0, 0, 1, 1], [], []>} : vector<128x128xbf16>, vector<128x128xbf16>, vector<128x128xf32> -> vector<128x128xf32>
    %c2 = arith.constant 2 : index
    %c0_22 = arith.constant 0 : index
    %44 = vector.load %arg4[%c2, %c0_22] : memref<3x128xf32, #tpu.memory_space<vmem>>, vector<1x128xf32>
    %45 = vector.broadcast %44 : vector<1x128xf32> to vector<128x128xf32>
    %46 = arith.addf %43, %45 : vector<128x128xf32>
    %cst_23 = arith.constant 2.000000e+01 : f32
    %47 = vector.broadcast %cst_23 : f32 to vector<128x128xf32>
    %48 = arith.minimumf %46, %47 : vector<128x128xf32>
    %49 = math.exp %48 : vector<128x128xf32>
    %cst_24 = arith.constant 1.000000e+00 : f32
    %50 = vector.broadcast %cst_24 : f32 to vector<128x128xf32>
    %51 = arith.addf %50, %49 : vector<128x128xf32>
    %52 = arith.mulf %51, %51 : vector<128x128xf32>
    %cst_25 = arith.constant 1.000000e+00 : f32
    %53 = vector.broadcast %cst_25 : f32 to vector<128x128xf32>
    %54 = arith.subf %52, %53 : vector<128x128xf32>
    %cst_26 = arith.constant 1.000000e+00 : f32
    %55 = vector.broadcast %cst_26 : f32 to vector<128x128xf32>
    %56 = arith.addf %52, %55 : vector<128x128xf32>
    %57 = tpu.reciprocal %56 {approx = true} : vector<128x128xf32> -> vector<128x128xf32>
    %58 = arith.mulf %54, %57 : vector<128x128xf32>
    %59 = arith.mulf %46, %58 : vector<128x128xf32>
    %60 = arith.truncf %59 : vector<128x128xf32> to vector<128x128xbf16>
    %61 = tpu.transpose %60, [1, 0] : vector<128x128xbf16> -> vector<128x128xbf16>
    %c0_27 = arith.constant 0 : index
    %c0_28 = arith.constant 0 : index
    %62 = vector.load %arg5[%c0_27, %c0_28] : memref<8x128xbf16, #tpu.memory_space<vmem>>, vector<8x128xbf16>
    %cst_29 = arith.constant dense<0.000000e+00> : vector<8x128xf32>
    %63 = tpu.matmul %62, %61, %cst_29 {dimension_numbers = #tpu.dot_dimension_numbers<[1], [0], [0], [1], [0, 0, 1, 1], [], []>} : vector<8x128xbf16>, vector<128x128xbf16>, vector<8x128xf32> -> vector<8x128xf32>
    %64 = vector.extract_strided_slice %63 {offsets = [0, 0], sizes = [1, 128], strides = [1, 1]} : vector<8x128xf32> to vector<1x128xf32>
    %c0_30 = arith.constant 0 : index
    %c0_31 = arith.constant 0 : index
    %65 = memref.load %arg6[%c0_30, %c0_31] : memref<1x1xf32, #tpu.memory_space<smem>>
    %66 = vector.broadcast %65 : f32 to vector<1x128xf32>
    %67 = arith.addf %64, %66 : vector<1x128xf32>
    %c0_32 = arith.constant 0 : index
    %c0_33 = arith.constant 0 : index
    %68 = vector.load %arg7[%c0_32, %c0_33] : memref<1x128xf32, #tpu.memory_space<vmem>>, vector<1x128xf32>
    tpu.vector_store %arg7[%c0_32, %c0_33], %67 {strides = array<i32>} : memref<1x128xf32, #tpu.memory_space<vmem>>, vector<1x128xf32>,
    return
  }
  func.func @transform_0(%arg0: i32) -> (i32, i32) {
    %c0_i32 = arith.constant 0 : i32
    %c0_i32_0 = arith.constant 0 : i32
    return %arg0, %c0_i32 : i32, i32
  }
  func.func @transform_1(%arg0: i32) -> (i32, i32) {
    %c0_i32 = arith.constant 0 : i32
    %c0_i32_0 = arith.constant 0 : i32
    %c0_i32_1 = arith.constant 0 : i32
    return %c0_i32, %c0_i32_0 : i32, i32
  }
  func.func @transform_2(%arg0: i32) -> (i32, i32, i32) {
    %c0_i32 = arith.constant 0 : i32
    %c0_i32_0 = arith.constant 0 : i32
    %c0_i32_1 = arith.constant 0 : i32
    %c0_i32_2 = arith.constant 0 : i32
    return %c0_i32, %c0_i32_0, %c0_i32_1 : i32, i32, i32
  }
  func.func @transform_3(%arg0: i32) -> (i32, i32) {
    %c0_i32 = arith.constant 0 : i32
    %c0_i32_0 = arith.constant 0 : i32
    %c0_i32_1 = arith.constant 0 : i32
    return %c0_i32, %c0_i32_0 : i32, i32
  }
  func.func @transform_4(%arg0: i32) -> (i32, i32) {
    %c0_i32 = arith.constant 0 : i32
    %c0_i32_0 = arith.constant 0 : i32
    %c0_i32_1 = arith.constant 0 : i32
    return %c0_i32, %c0_i32_0 : i32, i32
  }
  func.func @transform_5(%arg0: i32) -> (i32, i32) {
    %c0_i32 = arith.constant 0 : i32
    %c0_i32_0 = arith.constant 0 : i32
    %c0_i32_1 = arith.constant 0 : i32
    return %c0_i32, %c0_i32_0 : i32, i32
  }
  func.func @transform_6(%arg0: i32) -> (i32, i32) {
    %c0_i32 = arith.constant 0 : i32
    %c0_i32_0 = arith.constant 0 : i32
    return %c0_i32, %arg0 : i32, i32
  }
}

</mosaic_0001>

<bundles_post_ra>
// kernel: tpu_custom_call.1
= control target key start
LH: loop header
LB: loop body
LE: loop exit
PB: predicated region body
PF: predicated region fallthrough
CT: control target
= control target key end

     0   :  { %s2417_s0 = inlined_call_operand.vmem [shape: f32[256,16], index: 0, kind: input, shape index: {}]   ;;  %s2418_s1 = inlined_call_operand.vmem [shape: bf16[16,128], index: 1, kind: input, shape index: {}]   ;;  %s2419_s2 = inlined_call_operand.vmem [shape: bf16[2,128,128], index: 2, kind: input, shape index: {}]   ;;  %s2420_s3 = inlined_call_operand.vmem [shape: f32[3,128], index: 3, kind: input, shape index: {}]   ;;  %s2421_s4 = inlined_call_operand.vmem [shape: bf16[8,128], index: 4, kind: input, shape index: {}]   ;;  %s2422_s5 = inlined_call_operand.<no memory space> [shape: f32[1,1], index: 5, kind: input, shape index: {}]   ;;  %s2423_s6 = inlined_call_operand.hbm [shape: f32[1,256], index: 6, kind: output, shape index: {}]  }
   0x1   :  { %11 = sst [smem:[#allocation2]] %s2422_s5 }
   0x2   :  { %12 = vsyncpa [#allocation4], 0 }
   0x3   :  { %14 = vsyncpa [#allocation4 + $0x1], 0  ;;  %s1970_s23 = smov 0   ;;  %s1972_s24 = smov 0  }
   0x4   :  { %s1974_s25 = smov 0   ;;  %s1976_s26 = smov 0  }
   0x5 LB: > { %s1361_s5 = sadd.s32 4294967295, %s1927_s26   ;;  %s1362_s27 = sadd.s32 4294967294, %s1927_s26   ;;  %s1927_s26 = sphi %s1976_s26, %s2429_s26   ;;  %s1923_s25 = sphi %s1974_s25, %s2428_s25   ;;  %s1919_s24 = sphi %s1972_s24, %s2427_s24   ;;  %s1915_s23 = sphi %s1970_s23, %s2426_s23  }
   0x6   : > { %s1993_s28 = sadd.s32 1, %s1927_s26   ;;  %s158_s29 = sadd.s32 1, %s1923_s25 }
   0x7   : > { %s155_s30 = ssub.s32 %s1927_s26, %s1993_s28  ;;  %p168_p0 = scmp.ne.s32.totalorder %s1923_s25, %s1919_s24 }
   0x8   : > { %p156_p1 = scmp.eq.s32.totalorder %s155_s30, 0  ;;  %p169_p2 = scmp.eq.s32.totalorder %s1361_s5, 1 }
   0x9   : > { %p174_p3 = scmp.ne.s32.totalorder %s1919_s24, %s1915_s23  ;;  %p175_p4 = scmp.eq.s32.totalorder %s1362_s27, 1 }
   0xa   : > { %s2003_s7 = scalar_select %p156_p1, %s1923_s25, %s158_s29  }
   0xb   : > { %p2005_p5 = por %p169_p2, %p168_p0  ;;  %p2009_p6 = por %p175_p4, %p174_p3 }
   0xc   : > { %p1365_p7 = scmp.ge.s32.totalorder %s1927_s26, 1  ;;  %p217_p8 = scmp.lt.s32.totalorder %s1927_s26, 3 }
   0xe   : > { %p218_p9 = pnand %p1365_p7, %p217_p8 }
   0xf   : > { %v1656_v0 = vld [vmem:[%s2418_s1] sm:$0xff] (!%p218_p9)   ;;  %s2018_s12 = sshll.u32 (!%p218_p9), %s1361_s5, 4  ;;  %vm290_vm0 = vcmask (!%p218_p9), 130048   ;;  %v1658_v26 = vld [vmem:[%s2419_s2 + $0x8] sm:$0xff] (!%p218_p9)   ;;  %v1659_v27 = vld [vmem:[%s2419_s2 + $0x10] sm:$0xff] (!%p218_p9)   ;;  %vm1930_vm1 = vmmov (!%p218_p9), 0  }
  0x10   : > { %221 = sbr.rel (%p218_p9) target bundleno = 1089 (0x441), region = 44  ;;  %p247_p10 = scmp.lt.s32.totalorder (!%p218_p9), %s2018_s12, 31  ;;  %1513 = vmatprep.subr.bf16.mxu1 (!%p218_p9), %v1656_v0  ;;  %v1657_v25 = vld [vmem:[%s2419_s2] sm:$0xff] (!%p218_p9)   ;;  %v1660_v28 = vld [vmem:[%s2419_s2 + $0x18] sm:$0xff] (!%p218_p9)   ;;  %v1662_v30 = vld [vmem:[%s2419_s2 + $0x28] sm:$0xff] (!%p218_p9)  }
  0x11   : > { %1514 = vmatpush3.bf16.msra.mxu1 (!%p218_p9), %v1656_v0  ;;  %1531 = vmatprep.subr.bf16.mxu0 (!%p218_p9), %v1657_v25  ;;  %v1661_v29 = vld [vmem:[%s2419_s2 + $0x20] sm:$0xff] (!%p218_p9)   ;;  %v1663_v31 = vld [vmem:[%s2419_s2 + $0x30] sm:$0xff] (!%p218_p9)   ;;  %v1664_v32 = vld [vmem:[%s2419_s2 + $0x38] sm:$0xff] (!%p218_p9)   ;;  %s1290_s30 = sld [smem:[#allocation2]] (!%p218_p9)  ;;  %s244_s10 = sand.u32 (!%p218_p9), 1, %s1919_s24  }
  0x12   : > { %1532 = vmatpush3.bf16.msra.mxu0 (!%p218_p9), %v1657_v25  ;;  %v2078_v33 = vld [vmem:[%s2420_s3] ss:$0 sm:$0xff] (!%p218_p9)  ;;  %s245_s11 = scalar_lea.vmem (!%p218_p9), [#allocation3], %s244_s10  ;;  %s2375_s16 = scalar_lea.hbm (!%p218_p9), %s2423_s6, %s2018_s12 }
  0x13   : > { %1533 = vmatprep.subr.bf16.mxu0 (!%p218_p9), %v1658_v26  ;;  %s1931_s19 = smov (!%p218_p9), [#allocation3]  }
  0x14   : > { %s1869_s20 = sshll.u32 (!%p218_p9), %s1931_s19, 4  ;;  %s1870_s20 = int_to_ptr.vmem [resolvable:$false] %s1869_s20 }
  0x15   : > { %s1871_s21 = scalar_lea.vmem (!%p218_p9), %s1870_s20, 32 }
  0x16   : > { %1534 = vmatpush3.bf16.msra.mxu0 (!%p218_p9), %v1658_v26 }
  0x17   : > { %s248_s13 = scalar_select %p247_p10, %s2018_s12, 31  ;;  %1535 = vmatprep.subr.bf16.mxu0 %v1659_v27 }
  0x19   : > { %s1367_s14 = sshll.u32 %s248_s13, 3  ;;  %s1307_s13 = sshll.u32 %s245_s11, 4  ;;  %s2377_s13 = int_to_ptr.vmem [resolvable:$true] %s1307_s13 }
  0x1a   : > { %s2025_s17 = scalar_lea.vmem %s2417_s0, %s1367_s14  ;;  %1536 = vmatpush3.bf16.msra.mxu0 %v1659_v27  ;;  %s1865_s18 = scalar_lea.vmem %s2377_s13, 16 }
  0x1b   : > { %v253_v1 = vld [vmem:[%s2025_s17] sm:$0xff]  ;;  %v254_v2 = vld [vmem:[%s2025_s17 + $0x8] sm:$0xff]  ;;  %v255_v3 = vld [vmem:[%s2025_s17 + $0x10] sm:$0xff]  ;;  %1537 = vmatprep.subr.bf16.mxu0 %v1660_v28  ;;  %p1866_p11 = scmp.ne.s32.totalorder %s2377_s13, %s1865_s18  ;;  %p1872_p0 = scmp.lt.s32.totalorder %s2377_s13, %s1870_s20 }
  0x1c   : > { %v269_v4 = vpack.c.bf16 %v254_v2, %v253_v1  ;;  %v256_v5 = vld [vmem:[%s2025_s17 + $0x18] sm:$0xff]  ;;  %v257_v6 = vld [vmem:[%s2025_s17 + $0x20] sm:$0xff]  ;;  %v258_v7 = vld [vmem:[%s2025_s17 + $0x28] sm:$0xff]  ;;  %p1873_p1 = scmp.lt.s32.totalorder %s1871_s21, %s1865_s18 }
  0x1d   : > { %v270_v8 = vpack.c.bf16 %v256_v5, %v255_v3  ;;  %v271_v9 = vpack.c.bf16 %v258_v7, %v257_v6  ;;  %v259_v10 = vld [vmem:[%s2025_s17 + $0x30] sm:$0xff]  ;;  %v260_v11 = vld [vmem:[%s2025_s17 + $0x38] sm:$0xff]  ;;  %v261_v12 = vld [vmem:[%s2025_s17 + $0x40] sm:$0xff]  ;;  %p1867_p12 = pnand %p1866_p11, %p2005_p5 }
  0x1e   : > { %1515 = vmatprep.mubr.msk.bf16.mxu1 %vm290_vm0, %v269_v4  ;;  %v262_v13 = vld [vmem:[%s2025_s17 + $0x48] sm:$0xff]  ;;  %v272_v14 = vpack.c.bf16 %v260_v11, %v259_v10  ;;  %v263_v16 = vld [vmem:[%s2025_s17 + $0x50] sm:$0xff]  ;;  %v264_v17 = vld [vmem:[%s2025_s17 + $0x58] sm:$0xff]  ;;  %1538 = vmatpush3.bf16.msra.mxu0 %v1660_v28  ;;  %p1874_p2 = por %p1873_p1, %p1872_p0 }
  0x1f   : > { %1516 = vmatmul.mubr.msk.bf16.vlgmr.msra.gmra.mrb[0].mxu1 %vm290_vm0, %v270_v8  ;;  %v273_v15 = vpack.c.bf16 %v262_v13, %v261_v12  ;;  %v265_v18 = vld [vmem:[%s2025_s17 + $0x60] sm:$0xff]  ;;  %v266_v19 = vld [vmem:[%s2025_s17 + $0x68] sm:$0xff]  ;;  %v274_v20 = vpack.c.bf16 %v264_v17, %v263_v16  ;;  %v267_v22 = vld [vmem:[%s2025_s17 + $0x70] sm:$0xff]  ;;  %1539 = vmatprep.subr.bf16.mxu0 %v1661_v29  ;;  %p1868_p13 = pneg %p1867_p12 }
  0x20   : > { %1519 = vmatprep.mubr.msk.bf16.mxu1 %vm290_vm0, %v271_v9  ;;  %v275_v21 = vpack.c.bf16 %v266_v19, %v265_v18  ;;  %v268_v23 = vld [vmem:[%s2025_s17 + $0x78] sm:$0xff]  ;;  %s1295_s17 = scalar_lea.sflag [#allocation4], %s244_s10 }
  0x21   : > { %v276_v24 = vpack.c.bf16 %v268_v23, %v267_v22  ;;  %p1875_p3 = pnand %p1874_p2, %p1868_p13 }
  0x22   : > { %1540 = vmatpush3.bf16.msra.mxu0 %v1661_v29 }
  0x23   : > { %1541 = vmatprep.subr.bf16.mxu0 %v1662_v30 }
  0x26   : > { %1542 = vmatpush3.bf16.msra.mxu0 %v1662_v30 }
  0x27   : > { %1520 = vmatmul.mubr.msk.bf16.gmra.mrb[4].mxu1 %vm290_vm0, %v272_v14  ;;  %1543 = vmatprep.subr.bf16.mxu0 %v1663_v31 }
  0x28   : > { %1523 = vmatprep.mubr.msk.bf16.mxu1 %vm290_vm0, %v273_v15 }
  0x2a   : > { %1544 = vmatpush3.bf16.msra.mxu0 %v1663_v31 }
  0x2b   : > { %1545 = vmatprep.subr.bf16.mxu0 %v1664_v32 }
  0x2e   : > { %1546 = vmatpush3.bf16.msra.mxu0 %v1664_v32 }
  0x2f   : > { %1524 = vmatmul.mubr.msk.bf16.gmra.mrb[8].mxu1 %vm290_vm0, %v274_v20 }
  0x30   : > { %1527 = vmatprep.mubr.msk.bf16.mxu1 %vm290_vm0, %v275_v21 }
  0x37   : > { %1528 = vmatmul.mubr.msk.bf16.gmra.mrb[12].mxu1 %vm290_vm0, %v276_v24 }
  0xf2   : > { %v1517_v34 = vpop.f32.mrb[0].mxu1 }
  0xf3   : > { %v2081_v35 = vadd.f32 %v1517_v34, %v2078_v33  ;;  %v349_v36 = vpop.f32.mrb[1].mxu1 }
  0xf4   : > { %v2084_v37 = vadd.f32 %v2078_v33, %v349_v36  ;;  %v1518_v38 = vpop.f32.mrb[2].mxu1 }
  0xf5   : > { %v414_v39 = vmin.f32 %v2081_v35, 20.0  ;;  %v2088_v40 = vadd.f32 %v1518_v38, %v2078_v33  ;;  %v352_v41 = vpop.f32.mrb[3].mxu1 }
  0xf6   : > { %v412_v42 = vmin.f32 %v2084_v37, 20.0  ;;  %v2092_v43 = vadd.f32 %v2078_v33, %v352_v41 }
  0xf7   : > { %v432_v44 = vmul.f32 1.442695, %v414_v39  ;;  %v415_v45 = vmin.f32 %v2088_v40, 20.0 }
  0xf8   : > { %v428_v46 = vmul.f32 1.442695, %v412_v42  ;;  %v413_v47 = vmin.f32 %v2092_v43, 20.0 }
  0xf9   : > { %1673 = vpow2.f32 %v432_v44  ;;  %v434_v48 = vmul.f32 1.442695, %v415_v45 }
  0xfa   : > { %1675 = vpow2.f32 %v428_v46  ;;  %v430_v49 = vmul.f32 1.442695, %v413_v47  ;;  %v1521_v50 = vpop.f32.mrb[4].mxu1 }
  0xfb   : > { %1677 = vpow2.f32 %v434_v48  ;;  %v2097_v51 = vadd.f32 %v1521_v50, %v2078_v33  ;;  %v365_v52 = vpop.f32.mrb[5].mxu1 }
  0xfc   : > { %1679 = vpow2.f32 %v430_v49  ;;  %v2100_v53 = vadd.f32 %v2078_v33, %v365_v52  ;;  %v1522_v54 = vpop.f32.mrb[6].mxu1 }
  0xfd   : > { %v418_v55 = vmin.f32 %v2097_v51, 20.0  ;;  %v2104_v56 = vadd.f32 %v1522_v54, %v2078_v33  ;;  %v368_v57 = vpop.f32.mrb[7].mxu1 }
  0xfe   : > { %v416_v58 = vmin.f32 %v2100_v53, 20.0  ;;  %v2108_v59 = vadd.f32 %v2078_v33, %v368_v57 }
  0xff   : > { %v440_v60 = vmul.f32 1.442695, %v418_v55  ;;  %v419_v61 = vmin.f32 %v2104_v56, 20.0 }
 0x100   : > { %v436_v62 = vmul.f32 1.442695, %v416_v58  ;;  %v417_v63 = vmin.f32 %v2108_v59, 20.0 }
 0x101   : > { %1681 = vpow2.f32 %v440_v60  ;;  %v442_v0 = vmul.f32 1.442695, %v419_v61 }
 0x102   : > { %1683 = vpow2.f32 %v436_v62  ;;  %v438_v1 = vmul.f32 1.442695, %v417_v63  ;;  %v1525_v2 = vpop.f32.mrb[8].mxu1 }
 0x103   : > { %v1674_v3 = vpop.eup %1673  ;;  %1685 = vpow2.f32 %v442_v0  ;;  %v2113_v4 = vadd.f32 %v1525_v2, %v2078_v33  ;;  %v381_v5 = vpop.f32.mrb[9].mxu1 }
 0x104   : > { %v1676_v6 = vpop.eup %1675  ;;  %v462_v7 = vadd.f32 1.0, %v1674_v3  ;;  %1687 = vpow2.f32 %v438_v1  ;;  %v2116_v8 = vadd.f32 %v2078_v33, %v381_v5  ;;  %v1526_v9 = vpop.f32.mrb[10].mxu1 }
 0x105   : > { %v1678_v10 = vpop.eup %1677  ;;  %v460_v11 = vadd.f32 1.0, %v1676_v6  ;;  %v422_v12 = vmin.f32 %v2113_v4, 20.0  ;;  %v2120_v13 = vadd.f32 %v1526_v9, %v2078_v33  ;;  %v384_v14 = vpop.f32.mrb[11].mxu1 }
 0x106   : > { %v1680_v15 = vpop.eup %1679  ;;  %v478_v16 = vmul.f32 %v462_v7, %v462_v7  ;;  %v463_v17 = vadd.f32 1.0, %v1678_v10  ;;  %v420_v18 = vmin.f32 %v2116_v8, 20.0  ;;  %v2124_v19 = vadd.f32 %v2078_v33, %v384_v14 }
 0x107   : > { %v476_v20 = vmul.f32 %v460_v11, %v460_v11  ;;  %v461_v21 = vadd.f32 1.0, %v1680_v15  ;;  %v448_v22 = vmul.f32 1.442695, %v422_v12  ;;  %v423_v23 = vmin.f32 %v2120_v13, 20.0 }
 0x108   : > { %v510_v24 = vadd.f32 1.0, %v478_v16  ;;  %v479_v25 = vmul.f32 %v463_v17, %v463_v17  ;;  %v444_v29 = vmul.f32 1.442695, %v420_v18  ;;  %v421_v30 = vmin.f32 %v2124_v19, 20.0 }
 0x109   : > { %v508_v26 = vadd.f32 1.0, %v476_v20  ;;  %v477_v27 = vmul.f32 %v461_v21, %v461_v21  ;;  %1689 = vpow2.f32 %v448_v22  ;;  %v450_v36 = vmul.f32 1.442695, %v423_v23 }
 0x10a   : > { %1691 = vrcp.f32 %v510_v24  ;;  %v511_v28 = vadd.f32 1.0, %v479_v25  ;;  %v1529_v31 = vpop.f32.mrb[12].mxu1  ;;  %v446_v44 = vmul.f32 1.442695, %v421_v30  ;;  %v1380_v3 = vadd.f32 -1.0, %v478_v16 }
 0x10b   : > { %v1682_v32 = vpop.eup %1681  ;;  %1693 = vrcp.f32 %v508_v26  ;;  %v509_v34 = vadd.f32 1.0, %v477_v27  ;;  %v2129_v38 = vadd.f32 %v1529_v31, %v2078_v33  ;;  %v397_v39 = vpop.f32.mrb[13].mxu1  ;;  %v1381_v9 = vadd.f32 -1.0, %v479_v25 }
 0x10c   : > { %v1684_v41 = vpop.eup %1683  ;;  %1695 = vrcp.f32 %v511_v28  ;;  %v466_v42 = vadd.f32 1.0, %v1682_v32  ;;  %v2132_v45 = vadd.f32 %v2078_v33, %v397_v39  ;;  %v1530_v46 = vpop.f32.mrb[14].mxu1  ;;  %v1378_v17 = vadd.f32 -1.0, %v476_v20 }
 0x10d   : > { %v1686_v47 = vpop.eup %1685  ;;  %1697 = vrcp.f32 %v509_v34  ;;  %v464_v48 = vadd.f32 1.0, %v1684_v41  ;;  %v426_v49 = vmin.f32 %v2129_v38, 20.0  ;;  %v2136_v50 = vadd.f32 %v1530_v46, %v2078_v33  ;;  %v400_v52 = vpop.f32.mrb[15].mxu1 }
 0x10e   : > { %v1688_v54 = vpop.eup %1687  ;;  %v482_v55 = vmul.f32 %v466_v42, %v466_v42  ;;  %v467_v57 = vadd.f32 1.0, %v1686_v47  ;;  %1699 = vpow2.f32 %v444_v29  ;;  %v424_v58 = vmin.f32 %v2132_v45, 20.0 }
 0x10f   : > { %v480_v60 = vmul.f32 %v464_v48, %v464_v48  ;;  %v465_v61 = vadd.f32 1.0, %v1688_v54  ;;  %1701 = vpow2.f32 %v450_v36  ;;  %v456_v62 = vmul.f32 1.442695, %v426_v49 }
 0x110   : > { %v514_v63 = vadd.f32 1.0, %v482_v55  ;;  %v483_v0 = vmul.f32 %v467_v57, %v467_v57  ;;  %1703 = vpow2.f32 %v446_v44  ;;  %v452_v6 = vmul.f32 1.442695, %v424_v58 }
 0x111   : > { %v512_v1 = vadd.f32 1.0, %v480_v60  ;;  %v481_v2 = vmul.f32 %v465_v61, %v465_v61  ;;  %1705 = vpow2.f32 %v456_v62  ;;  %v427_v11 = vmin.f32 %v2136_v50, 20.0 }
 0x112   : > { %1707 = vrcp.f32 %v514_v63  ;;  %v515_v5 = vadd.f32 1.0, %v483_v0  ;;  %v2141_v15 = vadd.f32 %v2078_v33, %v400_v52  ;;  %v1379_v22 = vadd.f32 -1.0, %v477_v27 }
 0x113   : > { %v1690_v7 = vpop.eup %1689  ;;  %1709 = vrcp.f32 %v512_v1  ;;  %v513_v10 = vadd.f32 1.0, %v481_v2  ;;  %v458_v16 = vmul.f32 1.442695, %v427_v11  ;;  %v1384_v36 = vadd.f32 -1.0, %v482_v55 }
 0x114   : > { %v1692_v12 = vpop.eup %1691  ;;  %1711 = vrcp.f32 %v515_v5  ;;  %v470_v14 = vadd.f32 1.0, %v1690_v7  ;;  %v425_v25 = vmin.f32 %v2141_v15, 20.0  ;;  %v1382_v42 = vadd.f32 -1.0, %v480_v60 }
 0x115   : > { %v1694_v18 = vpop.eup %1693  ;;  %v542_v21 = vmul.f32 %v1692_v12, %v1380_v3  ;;  %1713 = vrcp.f32 %v513_v10  ;;  %v1385_v62 = vadd.f32 -1.0, %v483_v0 }
 0x116   : > { %v1696_v23 = vpop.eup %1695  ;;  %v2143_v24 = vmul.f32 %v470_v14, %v470_v14  ;;  %1715 = vpow2.f32 %v452_v6  ;;  %v540_v26 = vmul.f32 %v1694_v18, %v1378_v17  ;;  %v454_v31 = vmul.f32 1.442695, %v425_v25 }
 0x117   : > { %v1698_v28 = vpop.eup %1697  ;;  %v543_v29 = vmul.f32 %v1696_v23, %v1381_v9  ;;  %1717 = vpow2.f32 %v458_v16  ;;  %v558_v34 = vmul.f32 %v542_v21, %v2081_v35 }
 0x118   : > { %v1700_v30 = vpop.eup %1699  ;;  %v518_v33 = vadd.f32 1.0, %v2143_v24  ;;  %v541_v20 = vmul.f32 %v1698_v28, %v1379_v22  ;;  %v556_v46 = vmul.f32 %v540_v26, %v2084_v37  ;;  %1719 = vpow2.f32 %v454_v31 }
 0x119   : > { %v1702_v32 = vpop.eup %1701  ;;  %v559_v27 = vmul.f32 %v543_v29, %v2088_v40  ;;  %v468_v39 = vadd.f32 1.0, %v1700_v30  ;;  %v1383_v37 = vadd.f32 -1.0, %v481_v2  ;;  %v1388_v29 = vadd.f32 -1.0, %v2143_v24 }
 0x11a   : > { %v1704_v41 = vpop.eup %1703  ;;  %v471_v44 = vadd.f32 1.0, %v1702_v32  ;;  %v557_v47 = vmul.f32 %v541_v20, %v2092_v43  ;;  %1721 = vrcp.f32 %v518_v33 }
 0x11b   : > { %v1706_v48 = vpop.eup %1705  ;;  %v484_v49 = vmul.f32 %v468_v39, %v468_v39  ;;  %v469_v52 = vadd.f32 1.0, %v1704_v41  ;;  %v573_v54 = vpack.c.bf16 %v559_v27, %v558_v34 }
 0x11c   : > { %v1708_v57 = vpop.eup %1707  ;;  %v487_v58 = vmul.f32 %v471_v44, %v471_v44  ;;  %v474_v35 = vadd.f32 1.0, %v1706_v48  ;;  %v572_v61 = vpack.c.bf16 %v557_v47, %v556_v46 }
 0x11d   : > { %v1710_v40 = vpop.eup %1709  ;;  %v546_v55 = vmul.f32 %v1708_v57, %v1384_v36  ;;  %v516_v63 = vadd.f32 1.0, %v484_v49  ;;  %v485_v60 = vmul.f32 %v469_v52, %v469_v52  ;;  %v1386_v31 = vadd.f32 -1.0, %v484_v49 }
 0x11e   : > { %v1712_v1 = vpop.eup %1711  ;;  %v544_v3 = vmul.f32 %v1710_v40, %v1382_v42  ;;  %v519_v5 = vadd.f32 1.0, %v487_v58  ;;  %v490_v43 = vmul.f32 %v474_v35, %v474_v35  ;;  %1547 = vmatprep.mubr.bf16.mxu0 %v572_v61  ;;  %v1389_v20 = vadd.f32 -1.0, %v487_v58 }
 0x11f   : > { %v1714_v6 = vpop.eup %1713  ;;  %v547_v7 = vmul.f32 %v1712_v1, %v1385_v62  ;;  %1723 = vrcp.f32 %v516_v63  ;;  %1548 = vmatmul.mubr.bf16.vlgmr.msra.gmra.mrb[0].mxu0 %v573_v54  ;;  %v517_v11 = vadd.f32 1.0, %v485_v60  ;;  %v562_v14 = vmul.f32 %v546_v55, %v2097_v51 }
 0x120   : > { %v1716_v9 = vpop.eup %1715  ;;  %v545_v10 = vmul.f32 %v1714_v6, %v1383_v37  ;;  %1725 = vrcp.f32 %v519_v5  ;;  %v522_v17 = vadd.f32 1.0, %v490_v43  ;;  %v560_v2 = vmul.f32 %v544_v3, %v2100_v53  ;;  %v1670_v6 = vld [vmem:[%s2419_s2 + $0x68] sm:$0xff]  }
 0x121   : > { %v1718_v12 = vpop.eup %1717  ;;  %v563_v0 = vmul.f32 %v547_v7, %v2104_v56  ;;  %v472_v18 = vadd.f32 1.0, %v1716_v9  ;;  %1727 = vrcp.f32 %v517_v11  ;;  %v1387_v34 = vadd.f32 -1.0, %v485_v60  ;;  %v1671_v7 = vld [vmem:[%s2419_s2 + $0x70] sm:$0xff]   ;;  %v1672_v9 = vld [vmem:[%s2419_s2 + $0x78] sm:$0xff]  }
 0x122   : > { %v561_v21 = vmul.f32 %v545_v10, %v2108_v59  ;;  %v475_v16 = vadd.f32 1.0, %v1718_v12  ;;  %1729 = vrcp.f32 %v522_v17  ;;  %v1720_v28 = vpop.eup %1719  ;;  %v1392_v47 = vadd.f32 -1.0, %v490_v43  ;;  %v1665_v43 = vld [vmem:[%s2419_s2 + $0x40] sm:$0xff]  }
 0x123   : > { %v488_v22 = vmul.f32 %v472_v18, %v472_v18  ;;  %v575_v23 = vpack.c.bf16 %v563_v0, %v562_v14  ;;  %v473_v56 = vadd.f32 1.0, %v1720_v28  ;;  %1563 = vmatprep.subr.bf16.mxu0 %v1665_v43  ;;  %v2191_v10 = vld [vmem:[%s2420_s3 + $0x1] ss:$0 sm:$0xff] }
 0x124   : > { %v491_v25 = vmul.f32 %v475_v16, %v475_v16  ;;  %v574_v26 = vpack.c.bf16 %v561_v21, %v560_v2  ;;  %v1722_v51 = vpop.eup %1721  ;;  %1564 = vmatpush3.bf16.msra.mxu0 %v1665_v43 }
 0x125   : > { %v520_v30 = vadd.f32 1.0, %v488_v22  ;;  %v489_v53 = vmul.f32 %v473_v56, %v473_v56  ;;  %v550_v32 = vmul.f32 %v1722_v51, %v1388_v29  ;;  %v1390_v61 = vadd.f32 -1.0, %v488_v22 }
 0x126   : > { %v523_v33 = vadd.f32 1.0, %v491_v25  ;;  %1551 = vmatprep.mubr.bf16.mxu0 %v574_v26  ;;  %v1393_v54 = vadd.f32 -1.0, %v491_v25 }
 0x127   : > { %1731 = vrcp.f32 %v520_v30  ;;  %1552 = vmatmul.mubr.bf16.gmra.mrb[4].mxu0 %v575_v23  ;;  %v521_v36 = vadd.f32 1.0, %v489_v53  ;;  %v566_v24 = vmul.f32 %v550_v32, %v2113_v4  ;;  %v1391_v63 = vadd.f32 -1.0, %v489_v53 }
 0x128   : > { %1733 = vrcp.f32 %v523_v33 }
 0x129   : > { %v1724_v59 = vpop.eup %1723  ;;  %1735 = vrcp.f32 %v521_v36 }
 0x12a   : > { %v1726_v27 = vpop.eup %1725  ;;  %v548_v39 = vmul.f32 %v1724_v59, %v1386_v31 }
 0x12b   : > { %v551_v41 = vmul.f32 %v1726_v27, %v1389_v20  ;;  %v1728_v42 = vpop.eup %1727 }
 0x12c   : > { %v549_v46 = vmul.f32 %v1728_v42, %v1387_v34  ;;  %v1730_v48 = vpop.eup %1729  ;;  %v564_v49 = vmul.f32 %v548_v39, %v2116_v8 }
 0x12d   : > { %v567_v44 = vmul.f32 %v551_v41, %v2120_v13  ;;  %v554_v35 = vmul.f32 %v1730_v48, %v1392_v47 }
 0x12e   : > { %v565_v52 = vmul.f32 %v549_v46, %v2124_v19 }
 0x12f   : > { %v577_v57 = vpack.c.bf16 %v567_v44, %v566_v24  ;;  %v570_v4 = vmul.f32 %v554_v35, %v2129_v38  ;;  %v1666_v38 = vld [vmem:[%s2419_s2 + $0x48] sm:$0xff]  }
 0x130   : > { %v576_v40 = vpack.c.bf16 %v565_v52, %v564_v49  ;;  %1565 = vmatprep.subr.bf16.mxu0 %v1666_v38 }
 0x131   : > { %v1732_v58 = vpop.eup %1731  ;;  %1566 = vmatpush3.bf16.msra.mxu0 %v1666_v38 }
 0x132   : > { %v1734_v55 = vpop.eup %1733  ;;  %1555 = vmatprep.mubr.bf16.mxu0 %v576_v40  ;;  %v552_v13 = vmul.f32 %v1732_v58, %v1390_v61 }
 0x133   : > { %v555_v62 = vmul.f32 %v1734_v55, %v1393_v54  ;;  %1556 = vmatmul.mubr.bf16.gmra.mrb[8].mxu0 %v577_v57  ;;  %v1736_v1 = vpop.eup %1735 }
 0x134   : > { %v553_v8 = vmul.f32 %v1736_v1, %v1391_v63  ;;  %v568_v19 = vmul.f32 %v552_v13, %v2132_v45  ;;  %v1667_v45 = vld [vmem:[%s2419_s2 + $0x50] sm:$0xff]  }
 0x135   : > { %v571_v60 = vmul.f32 %v555_v62, %v2136_v50  ;;  %1567 = vmatprep.subr.bf16.mxu0 %v1667_v45  ;;  %v1668_v50 = vld [vmem:[%s2419_s2 + $0x58] sm:$0xff]  }
 0x136   : > { %v569_v37 = vmul.f32 %v553_v8, %v2141_v15  ;;  %1568 = vmatpush3.bf16.msra.mxu0 %v1667_v45  ;;  %v1669_v15 = vld [vmem:[%s2419_s2 + $0x60] sm:$0xff]  }
 0x137   : > { %v579_v3 = vpack.c.bf16 %v571_v60, %v570_v4  ;;  %1569 = vmatprep.subr.bf16.mxu0 %v1668_v50 }
 0x138   : > { %v578_v5 = vpack.c.bf16 %v569_v37, %v568_v19 }
 0x13a   : > { %1559 = vmatprep.mubr.bf16.mxu0 %v578_v5  ;;  %1570 = vmatpush3.bf16.msra.mxu0 %v1668_v50 }
 0x13b   : > { %1560 = vmatmul.mubr.bf16.gmra.mrb[12].mxu0 %v579_v3  ;;  %1571 = vmatprep.subr.bf16.mxu0 %v1669_v15 }
 0x13e   : > { %1572 = vmatpush3.bf16.msra.mxu0 %v1669_v15 }
 0x13f   : > { %1573 = vmatprep.subr.bf16.mxu0 %v1670_v6 }
 0x142   : > { %1574 = vmatpush3.bf16.msra.mxu0 %v1670_v6 }
 0x143   : > { %1575 = vmatprep.subr.bf16.mxu0 %v1671_v7 }
 0x146   : > { %1576 = vmatpush3.bf16.msra.mxu0 %v1671_v7 }
 0x147   : > { %1577 = vmatprep.subr.bf16.mxu0 %v1672_v9 }
 0x14a   : > { %1578 = vmatpush3.bf16.msra.mxu0 %v1672_v9 }
 0x1f2   : > { %v1549_v11 = vpop.f32.mrb[0].mxu0 }
 0x1f3   : > { %v2194_v12 = vadd.f32 %v1549_v11, %v2191_v10  ;;  %v683_v14 = vpop.f32.mrb[1].mxu0 }
 0x1f4   : > { %v2197_v0 = vadd.f32 %v2191_v10, %v683_v14  ;;  %v1550_v17 = vpop.f32.mrb[2].mxu0 }
 0x1f5   : > { %v748_v18 = vmin.f32 %v2194_v12, 20.0  ;;  %v2201_v2 = vadd.f32 %v1550_v17, %v2191_v10  ;;  %v686_v21 = vpop.f32.mrb[3].mxu0 }
 0x1f6   : > { %v746_v16 = vmin.f32 %v2197_v0, 20.0  ;;  %v2205_v22 = vadd.f32 %v2191_v10, %v686_v21 }
 0x1f7   : > { %v766_v23 = vmul.f32 1.442695, %v748_v18  ;;  %v749_v25 = vmin.f32 %v2201_v2, 20.0 }
 0x1f8   : > { %v762_v26 = vmul.f32 1.442695, %v746_v16  ;;  %v747_v28 = vmin.f32 %v2205_v22, 20.0 }
 0x1f9   : > { %1737 = vpow2.f32 %v766_v23  ;;  %v768_v29 = vmul.f32 1.442695, %v749_v25 }
 0x1fa   : > { %1739 = vpow2.f32 %v762_v26  ;;  %v764_v30 = vmul.f32 1.442695, %v747_v28  ;;  %v1553_v51 = vpop.f32.mrb[4].mxu0 }
 0x1fb   : > { %1741 = vpow2.f32 %v768_v29  ;;  %v2210_v33 = vadd.f32 %v1553_v51, %v2191_v10  ;;  %v699_v56 = vpop.f32.mrb[5].mxu0 }
 0x1fc   : > { %1743 = vpow2.f32 %v764_v30  ;;  %v2213_v31 = vadd.f32 %v2191_v10, %v699_v56  ;;  %v1554_v20 = vpop.f32.mrb[6].mxu0 }
 0x1fd   : > { %v752_v53 = vmin.f32 %v2210_v33, 20.0  ;;  %v2217_v59 = vadd.f32 %v1554_v20, %v2191_v10  ;;  %v702_v32 = vpop.f32.mrb[7].mxu0 }
 0x1fe   : > { %v750_v34 = vmin.f32 %v2213_v31, 20.0  ;;  %v2221_v27 = vadd.f32 %v2191_v10, %v702_v32 }
 0x1ff   : > { %v774_v36 = vmul.f32 1.442695, %v752_v53  ;;  %v753_v39 = vmin.f32 %v2217_v59, 20.0 }
 0x200   : > { %v770_v41 = vmul.f32 1.442695, %v750_v34  ;;  %v751_v42 = vmin.f32 %v2221_v27, 20.0 }
 0x201   : > { %1745 = vpow2.f32 %v774_v36  ;;  %v776_v24 = vmul.f32 1.442695, %v753_v39 }
 0x202   : > { %1747 = vpow2.f32 %v770_v41  ;;  %v772_v44 = vmul.f32 1.442695, %v751_v42 }
 0x203   : > { %v1738_v46 = vpop.eup %1737  ;;  %1749 = vpow2.f32 %v776_v24 }
 0x204   : > { %v1740_v47 = vpop.eup %1739  ;;  %v796_v48 = vadd.f32 1.0, %v1738_v46  ;;  %1751 = vpow2.f32 %v772_v44 }
 0x205   : > { %v1742_v49 = vpop.eup %1741  ;;  %v794_v52 = vadd.f32 1.0, %v1740_v47 }
 0x206   : > { %v1744_v54 = vpop.eup %1743  ;;  %v812_v57 = vmul.f32 %v796_v48, %v796_v48  ;;  %v797_v58 = vadd.f32 1.0, %v1742_v49  ;;  %v1557_v40 = vpop.f32.mrb[8].mxu0 }
 0x207   : > { %v810_v35 = vmul.f32 %v794_v52, %v794_v52  ;;  %v795_v61 = vadd.f32 1.0, %v1744_v54  ;;  %v2226_v63 = vadd.f32 %v1557_v40, %v2191_v10  ;;  %v715_v4 = vpop.f32.mrb[9].mxu0 }
 0x208   : > { %v844_v55 = vadd.f32 1.0, %v812_v57  ;;  %v813_v62 = vmul.f32 %v797_v58, %v797_v58  ;;  %v2229_v1 = vadd.f32 %v2191_v10, %v715_v4  ;;  %v1558_v8 = vpop.f32.mrb[10].mxu0  ;;  %v1405_v28 = vadd.f32 -1.0, %v812_v57 }
 0x209   : > { %v842_v13 = vadd.f32 1.0, %v810_v35  ;;  %v811_v60 = vmul.f32 %v795_v61, %v795_v61  ;;  %v756_v19 = vmin.f32 %v2226_v63, 20.0  ;;  %v718_v37 = vpop.f32.mrb[11].mxu0  ;;  %v2234_v6 = vadd.f32 %v1558_v8, %v2191_v10 }
 0x20a   : > { %1753 = vrcp.f32 %v844_v55  ;;  %v845_v3 = vadd.f32 1.0, %v813_v62  ;;  %v754_v38 = vmin.f32 %v2229_v1, 20.0  ;;  %v2237_v14 = vadd.f32 %v2191_v10, %v718_v37 }
 0x20b   : > { %v1746_v5 = vpop.eup %1745  ;;  %1755 = vrcp.f32 %v842_v13  ;;  %v843_v43 = vadd.f32 1.0, %v811_v60  ;;  %v782_v15 = vmul.f32 1.442695, %v756_v19  ;;  %v757_v16 = vmin.f32 %v2234_v6, 20.0 }
 0x20c   : > { %v1748_v45 = vpop.eup %1747  ;;  %1757 = vrcp.f32 %v845_v3  ;;  %v800_v50 = vadd.f32 1.0, %v1746_v5  ;;  %v778_v11 = vmul.f32 1.442695, %v754_v38  ;;  %v755_v26 = vmin.f32 %v2237_v14, 20.0 }
 0x20d   : > { %v1750_v7 = vpop.eup %1749  ;;  %1759 = vrcp.f32 %v843_v43  ;;  %v798_v9 = vadd.f32 1.0, %v1748_v45  ;;  %v1403_v51 = vadd.f32 -1.0, %v810_v35  ;;  %v1406_v56 = vadd.f32 -1.0, %v813_v62 }
 0x20e   : > { %v1752_v17 = vpop.eup %1751  ;;  %v816_v18 = vmul.f32 %v800_v50, %v800_v50  ;;  %v801_v21 = vadd.f32 1.0, %v1750_v7  ;;  %1761 = vpow2.f32 %v782_v15  ;;  %v1561_v32 = vpop.f32.mrb[12].mxu0  ;;  %v784_v36 = vmul.f32 1.442695, %v757_v16 }
 0x20f   : > { %v814_v23 = vmul.f32 %v798_v9, %v798_v9  ;;  %v799_v25 = vadd.f32 1.0, %v1752_v17  ;;  %1763 = vpow2.f32 %v778_v11  ;;  %v2242_v39 = vadd.f32 %v1561_v32, %v2191_v10  ;;  %v731_v41 = vpop.f32.mrb[13].mxu0 }
 0x210   : > { %v848_v29 = vadd.f32 1.0, %v816_v18  ;;  %v817_v30 = vmul.f32 %v801_v21, %v801_v21  ;;  %v780_v24 = vmul.f32 1.442695, %v755_v26  ;;  %v2245_v44 = vadd.f32 %v2191_v10, %v731_v41  ;;  %v1562_v46 = vpop.f32.mrb[14].mxu0 }
 0x211   : > { %v846_v20 = vadd.f32 1.0, %v814_v23  ;;  %v815_v53 = vmul.f32 %v799_v25, %v799_v25  ;;  %v1404_v48 = vadd.f32 -1.0, %v811_v60  ;;  %v760_v49 = vmin.f32 %v2242_v39, 20.0  ;;  %v734_v54 = vpop.f32.mrb[15].mxu0 }
 0x212   : > { %1765 = vrcp.f32 %v848_v29  ;;  %v849_v34 = vadd.f32 1.0, %v817_v30  ;;  %v2249_v52 = vadd.f32 %v1562_v46, %v2191_v10  ;;  %v758_v35 = vmin.f32 %v2245_v44, 20.0 }
 0x213   : > { %1767 = vrcp.f32 %v846_v20  ;;  %v847_v42 = vadd.f32 1.0, %v815_v53  ;;  %v2253_v61 = vadd.f32 %v2191_v10, %v734_v54  ;;  %v790_v62 = vmul.f32 1.442695, %v760_v49 }
 0x214   : > { %v1754_v47 = vpop.eup %1753  ;;  %1769 = vrcp.f32 %v849_v34  ;;  %v761_v4 = vmin.f32 %v2249_v52, 20.0  ;;  %v786_v8 = vmul.f32 1.442695, %v758_v35  ;;  %v1409_v11 = vadd.f32 -1.0, %v816_v18 }
 0x215   : > { %v1756_v57 = vpop.eup %1755  ;;  %v876_v58 = vmul.f32 %v1754_v47, %v1405_v28  ;;  %1771 = vrcp.f32 %v847_v42  ;;  %v759_v45 = vmin.f32 %v2253_v61, 20.0  ;;  %v1407_v16 = vadd.f32 -1.0, %v814_v23 }
 0x216   : > { %v1758_v40 = vpop.eup %1757  ;;  %v874_v55 = vmul.f32 %v1756_v57, %v1403_v51  ;;  %1773 = vpow2.f32 %v784_v36  ;;  %v792_v5 = vmul.f32 1.442695, %v761_v4  ;;  %v1410_v29 = vadd.f32 -1.0, %v817_v30 }
 0x217   : > { %v1760_v13 = vpop.eup %1759  ;;  %v877_v60 = vmul.f32 %v1758_v40, %v1406_v56  ;;  %1775 = vpow2.f32 %v780_v24  ;;  %v892_v19 = vmul.f32 %v876_v58, %v2194_v12  ;;  %v788_v12 = vmul.f32 1.442695, %v759_v45 }
 0x218   : > { %v1762_v3 = vpop.eup %1761  ;;  %v875_v37 = vmul.f32 %v1760_v13, %v1404_v48  ;;  %1777 = vpow2.f32 %v790_v62  ;;  %v890_v50 = vmul.f32 %v874_v55, %v2197_v0  ;;  %v1408_v20 = vadd.f32 -1.0, %v815_v53 }
 0x219   : > { %v1764_v43 = vpop.eup %1763  ;;  %v893_v10 = vmul.f32 %v877_v60, %v2201_v2  ;;  %v804_v38 = vadd.f32 1.0, %v1762_v3  ;;  %1779 = vpow2.f32 %v786_v8 }
 0x21a   : > { %v891_v15 = vmul.f32 %v875_v37, %v2205_v22  ;;  %v802_v7 = vadd.f32 1.0, %v1764_v43  ;;  %1781 = vpow2.f32 %v792_v5 }
 0x21b   : > { %v907_v9 = vpack.c.bf16 %v893_v10, %v892_v19  ;;  %v820_v17 = vmul.f32 %v804_v38, %v804_v38  ;;  %1783 = vpow2.f32 %v788_v12 }
 0x21c   : > { %v1766_v21 = vpop.eup %1765  ;;  %v818_v25 = vmul.f32 %v802_v7, %v802_v7  ;;  %v906_v26 = vpack.c.bf16 %v891_v15, %v890_v50 }
 0x21d   : > { %v1768_v28 = vpop.eup %1767  ;;  %v880_v2 = vmul.f32 %v1766_v21, %v1409_v11  ;;  %v852_v32 = vadd.f32 1.0, %v820_v17  ;;  %v1413_v38 = vadd.f32 -1.0, %v820_v17 }
 0x21e   : > { %v1770_v51 = vpop.eup %1769  ;;  %v878_v56 = vmul.f32 %v1768_v28, %v1407_v16  ;;  %1579 = vmatprep.mubr.bf16.mxu0 %v906_v26  ;;  %v850_v36 = vadd.f32 1.0, %v818_v25  ;;  %v1411_v45 = vadd.f32 -1.0, %v818_v25 }
 0x21f   : > { %v1772_v0 = vpop.eup %1771  ;;  %v881_v22 = vmul.f32 %v1770_v51, %v1410_v29  ;;  %1580 = vmatmul.mubr.bf16.vlgmr.msra.gmra.mrb[16].mxu0 %v907_v9  ;;  %v896_v23 = vmul.f32 %v880_v2, %v2210_v33  ;;  %1785 = vrcp.f32 %v852_v32 }
 0x220   : > { %v1774_v34 = vpop.eup %1773  ;;  %v879_v18 = vmul.f32 %v1772_v0, %v1408_v20  ;;  %v894_v30 = vmul.f32 %v878_v56, %v2213_v31  ;;  %1787 = vrcp.f32 %v850_v36 }
 0x221   : > { %v1776_v41 = vpop.eup %1775  ;;  %v897_v42 = vmul.f32 %v881_v22, %v2217_v59  ;;  %v805_v24 = vadd.f32 1.0, %v1774_v34 }
 0x222   : > { %v1778_v46 = vpop.eup %1777  ;;  %v895_v47 = vmul.f32 %v879_v18, %v2221_v27  ;;  %v803_v53 = vadd.f32 1.0, %v1776_v41 }
 0x223   : > { %v1780_v48 = vpop.eup %1779  ;;  %v821_v49 = vmul.f32 %v805_v24, %v805_v24  ;;  %v808_v54 = vadd.f32 1.0, %v1778_v46  ;;  %v909_v57 = vpack.c.bf16 %v897_v42, %v896_v23 }
 0x224   : > { %v1782_v58 = vpop.eup %1781  ;;  %v819_v35 = vmul.f32 %v803_v53, %v803_v53  ;;  %v806_v40 = vadd.f32 1.0, %v1780_v48  ;;  %v908_v55 = vpack.c.bf16 %v895_v47, %v894_v30  ;;  %v1929_v30 = vmov 0.0  }
 0x225   : > { %v853_v33 = vadd.f32 1.0, %v821_v49  ;;  %v824_v62 = vmul.f32 %v808_v54, %v808_v54  ;;  %v809_v59 = vadd.f32 1.0, %v1782_v58  ;;  %v1784_v31 = vpop.eup %1783  ;;  %v1414_v15 = vadd.f32 -1.0, %v821_v49  ;;  %1595 = vmatprep.subr.bf16.mxu1 %v1929_v30  ;;  %1611 = vmatprep.mubr.msk.bf16.mxu1 %vm1930_vm1, %v1929_v30 }
 0x226   : > { %v851_v4 = vadd.f32 1.0, %v819_v35  ;;  %v822_v13 = vmul.f32 %v806_v40, %v806_v40  ;;  %1583 = vmatprep.mubr.bf16.mxu0 %v908_v55  ;;  %v807_v3 = vadd.f32 1.0, %v1784_v31  ;;  %v1412_v11 = vadd.f32 -1.0, %v819_v35 }
 0x227   : > { %1789 = vrcp.f32 %v853_v33  ;;  %v856_v27 = vadd.f32 1.0, %v824_v62  ;;  %v825_v60 = vmul.f32 %v809_v59, %v809_v59  ;;  %1584 = vmatmul.mubr.bf16.gmra.mrb[20].mxu0 %v909_v57  ;;  %v1417_v16 = vadd.f32 -1.0, %v824_v62 }
 0x228   : > { %1791 = vrcp.f32 %v851_v4  ;;  %v854_v8 = vadd.f32 1.0, %v822_v13  ;;  %v823_v37 = vmul.f32 %v807_v3, %v807_v3  ;;  %v1415_v22 = vadd.f32 -1.0, %v822_v13 }
 0x229   : > { %1793 = vrcp.f32 %v856_v27  ;;  %v857_v19 = vadd.f32 1.0, %v825_v60  ;;  %v1786_v43 = vpop.eup %1785  ;;  %v1418_v20 = vadd.f32 -1.0, %v825_v60 }
 0x22a   : > { %1795 = vrcp.f32 %v854_v8  ;;  %v855_v5 = vadd.f32 1.0, %v823_v37  ;;  %v1788_v10 = vpop.eup %1787  ;;  %v884_v50 = vmul.f32 %v1786_v43, %v1413_v38  ;;  %v1416_v36 = vadd.f32 -1.0, %v823_v37 }
 0x22b   : > { %1797 = vrcp.f32 %v857_v19  ;;  %v882_v9 = vmul.f32 %v1788_v10, %v1411_v45 }
 0x22c   : > { %1799 = vrcp.f32 %v855_v5  ;;  %v900_v29 = vmul.f32 %v884_v50, %v2226_v63 }
 0x22d   : > { %v898_v25 = vmul.f32 %v882_v9, %v2229_v1 }
 0x231   : > { %v1790_v7 = vpop.eup %1789 }
 0x232   : > { %v1792_v12 = vpop.eup %1791  ;;  %v885_v21 = vmul.f32 %v1790_v7, %v1414_v15 }
 0x233   : > { %v1794_v26 = vpop.eup %1793  ;;  %v883_v28 = vmul.f32 %v1792_v12, %v1412_v11 }
 0x234   : > { %v1796_v2 = vpop.eup %1795  ;;  %v901_v51 = vmul.f32 %v885_v21, %v2234_v6  ;;  %v888_v56 = vmul.f32 %v1794_v26, %v1417_v16 }
 0x235   : > { %v1798_v17 = vpop.eup %1797  ;;  %v899_v0 = vmul.f32 %v883_v28, %v2237_v14  ;;  %v886_v18 = vmul.f32 %v1796_v2, %v1415_v22 }
 0x236   : > { %v889_v32 = vmul.f32 %v1798_v17, %v1418_v20  ;;  %v911_v34 = vpack.c.bf16 %v901_v51, %v900_v29  ;;  %v1800_v23 = vpop.eup %1799  ;;  %v904_v42 = vmul.f32 %v888_v56, %v2242_v39  ;;  %v2278_v39 = vld [vmem:[%s2420_s3 + $0x2] ss:$0 sm:$0xff] }
 0x237   : > { %v910_v41 = vpack.c.bf16 %v899_v0, %v898_v25  ;;  %v887_v24 = vmul.f32 %v1800_v23, %v1416_v36  ;;  %v902_v46 = vmul.f32 %v886_v18, %v2245_v44 }
 0x238   : > { %v905_v63 = vmul.f32 %v889_v32, %v2249_v52 }
 0x239   : > { %1587 = vmatprep.mubr.bf16.mxu0 %v910_v41  ;;  %v903_v1 = vmul.f32 %v887_v24, %v2253_v61 }
 0x23a   : > { %1588 = vmatmul.mubr.bf16.gmra.mrb[24].mxu0 %v911_v34  ;;  %v913_v6 = vpack.c.bf16 %v905_v63, %v904_v42 }
 0x23b   : > { %v912_v14 = vpack.c.bf16 %v903_v1, %v902_v46 }
 0x23d   : > { %1591 = vmatprep.mubr.bf16.mxu0 %v912_v14 }
 0x242   : > { %1592 = vmatmul.mubr.bf16.gmra.mrb[28].mxu0 %v913_v6 }
 0x2f2   : > { %v1581_v52 = vpop.f32.mrb[16].mxu0 }
 0x2f3   : > { %v2281_v47 = vadd.f32 %v1581_v52, %v2278_v39  ;;  %v1018_v44 = vpop.f32.mrb[17].mxu0 }
 0x2f4   : > { %v2284_v61 = vadd.f32 %v2278_v39, %v1018_v44  ;;  %v1582_v53 = vpop.f32.mrb[18].mxu0 }
 0x2f5   : > { %v1083_v48 = vmin.f32 %v2281_v47, 20.0  ;;  %v2288_v49 = vadd.f32 %v1582_v53, %v2278_v39  ;;  %v1021_v54 = vpop.f32.mrb[19].mxu0 }
 0x2f6   : > { %v1081_v57 = vmin.f32 %v2284_v61, 20.0  ;;  %v2292_v58 = vadd.f32 %v2278_v39, %v1021_v54 }
 0x2f7   : > { %v1101_v35 = vmul.f32 1.442695, %v1083_v48  ;;  %v1084_v40 = vmin.f32 %v2288_v49, 20.0 }
 0x2f8   : > { %v1097_v55 = vmul.f32 1.442695, %v1081_v57  ;;  %v1082_v33 = vmin.f32 %v2292_v58, 20.0 }
 0x2f9   : > { %1801 = vpow2.f32 %v1101_v35  ;;  %v1103_v62 = vmul.f32 1.442695, %v1084_v40 }
 0x2fa   : > { %1803 = vpow2.f32 %v1097_v55  ;;  %v1099_v59 = vmul.f32 1.442695, %v1082_v33  ;;  %v1585_v4 = vpop.f32.mrb[20].mxu0 }
 0x2fb   : > { %1805 = vpow2.f32 %v1103_v62  ;;  %v2297_v13 = vadd.f32 %v1585_v4, %v2278_v39  ;;  %v1034_v31 = vpop.f32.mrb[21].mxu0 }
 0x2fc   : > { %1807 = vpow2.f32 %v1099_v59  ;;  %v2300_v27 = vadd.f32 %v2278_v39, %v1034_v31  ;;  %v1586_v60 = vpop.f32.mrb[22].mxu0 }
 0x2fd   : > { %v1087_v8 = vmin.f32 %v2297_v13, 20.0  ;;  %v2304_v3 = vadd.f32 %v1586_v60, %v2278_v39  ;;  %v1037_v19 = vpop.f32.mrb[23].mxu0 }
 0x2fe   : > { %v1085_v37 = vmin.f32 %v2300_v27, 20.0  ;;  %v2308_v5 = vadd.f32 %v2278_v39, %v1037_v19 }
 0x2ff   : > { %v1109_v43 = vmul.f32 1.442695, %v1087_v8  ;;  %v1088_v10 = vmin.f32 %v2304_v3, 20.0 }
 0x300   : > { %v1105_v38 = vmul.f32 1.442695, %v1085_v37  ;;  %v1086_v45 = vmin.f32 %v2308_v5, 20.0 }
 0x301   : > { %1809 = vpow2.f32 %v1109_v43  ;;  %v1111_v50 = vmul.f32 1.442695, %v1088_v10 }
 0x302   : > { %1811 = vpow2.f32 %v1105_v38  ;;  %v1107_v15 = vmul.f32 1.442695, %v1086_v45 }
 0x303   : > { %v1802_v7 = vpop.eup %1801  ;;  %1813 = vpow2.f32 %v1111_v50 }
 0x304   : > { %v1804_v9 = vpop.eup %1803  ;;  %v1131_v11 = vadd.f32 1.0, %v1802_v7  ;;  %1815 = vpow2.f32 %v1107_v15 }
 0x305   : > { %v1806_v12 = vpop.eup %1805  ;;  %v1129_v21 = vadd.f32 1.0, %v1804_v9 }
 0x306   : > { %v1808_v16 = vpop.eup %1807  ;;  %v1147_v26 = vmul.f32 %v1131_v11, %v1131_v11  ;;  %v1132_v28 = vadd.f32 1.0, %v1806_v12 }
 0x307   : > { %v1145_v2 = vmul.f32 %v1129_v21, %v1129_v21  ;;  %v1130_v29 = vadd.f32 1.0, %v1808_v16 }
 0x308   : > { %v1179_v51 = vadd.f32 1.0, %v1147_v26  ;;  %v1148_v56 = vmul.f32 %v1132_v28, %v1132_v28  ;;  %v1446_v62 = vadd.f32 -1.0, %v1147_v26 }
 0x309   : > { %v1177_v20 = vadd.f32 1.0, %v1145_v2  ;;  %v1146_v17 = vmul.f32 %v1130_v29, %v1130_v29  ;;  %v1444_v60 = vadd.f32 -1.0, %v1145_v2 }
 0x30a   : > { %1817 = vrcp.f32 %v1179_v51  ;;  %v1180_v25 = vadd.f32 1.0, %v1148_v56  ;;  %v1447_v10 = vadd.f32 -1.0, %v1148_v56 }
 0x30b   : > { %v1810_v0 = vpop.eup %1809  ;;  %1819 = vrcp.f32 %v1177_v20  ;;  %v1178_v22 = vadd.f32 1.0, %v1146_v17  ;;  %v1445_v38 = vadd.f32 -1.0, %v1146_v17 }
 0x30c   : > { %v1812_v32 = vpop.eup %1811  ;;  %1821 = vrcp.f32 %v1180_v25  ;;  %v1135_v34 = vadd.f32 1.0, %v1810_v0 }
 0x30d   : > { %v1814_v18 = vpop.eup %1813  ;;  %1823 = vrcp.f32 %v1178_v22  ;;  %v1133_v36 = vadd.f32 1.0, %v1812_v32  ;;  %v1589_v41 = vpop.f32.mrb[24].mxu0 }
 0x30e   : > { %v1816_v23 = vpop.eup %1815  ;;  %v1151_v42 = vmul.f32 %v1135_v34, %v1135_v34  ;;  %v1136_v63 = vadd.f32 1.0, %v1814_v18  ;;  %v2313_v24 = vadd.f32 %v1589_v41, %v2278_v39  ;;  %v1050_v6 = vpop.f32.mrb[25].mxu0 }
 0x30f   : > { %v1149_v46 = vmul.f32 %v1133_v36, %v1133_v36  ;;  %v1134_v1 = vadd.f32 1.0, %v1816_v23  ;;  %v2316_v14 = vadd.f32 %v2278_v39, %v1050_v6  ;;  %v1590_v52 = vpop.f32.mrb[26].mxu0 }
 0x310   : > { %v1183_v44 = vadd.f32 1.0, %v1151_v42  ;;  %v1152_v53 = vmul.f32 %v1136_v63, %v1136_v63  ;;  %v1091_v48 = vmin.f32 %v2313_v24, 20.0  ;;  %v1053_v54 = vpop.f32.mrb[27].mxu0  ;;  %v2321_v8 = vadd.f32 %v1590_v52, %v2278_v39 }
 0x311   : > { %v1181_v57 = vadd.f32 1.0, %v1149_v46  ;;  %v1150_v35 = vmul.f32 %v1134_v1, %v1134_v1  ;;  %v1089_v40 = vmin.f32 %v2316_v14, 20.0  ;;  %v2324_v19 = vadd.f32 %v2278_v39, %v1053_v54 }
 0x312   : > { %1825 = vrcp.f32 %v1183_v44  ;;  %v1184_v55 = vadd.f32 1.0, %v1152_v53  ;;  %v1117_v33 = vmul.f32 1.442695, %v1091_v48  ;;  %v1092_v7 = vmin.f32 %v2321_v8, 20.0 }
 0x313   : > { %1827 = vrcp.f32 %v1181_v57  ;;  %v1182_v59 = vadd.f32 1.0, %v1150_v35  ;;  %v1113_v4 = vmul.f32 1.442695, %v1089_v40  ;;  %v1090_v9 = vmin.f32 %v2324_v19, 20.0 }
 0x314   : > { %v1818_v31 = vpop.eup %1817  ;;  %1829 = vrcp.f32 %v1184_v55  ;;  %v1450_v16 = vadd.f32 -1.0, %v1151_v42  ;;  %v1119_v51 = vmul.f32 1.442695, %v1092_v7  ;;  %v1448_v42 = vadd.f32 -1.0, %v1149_v46 }
 0x315   : > { %v1820_v37 = vpop.eup %1819  ;;  %v1211_v43 = vmul.f32 %v1818_v31, %v1446_v62  ;;  %1831 = vrcp.f32 %v1182_v59  ;;  %v1593_v45 = vpop.f32.mrb[28].mxu0  ;;  %v1115_v56 = vmul.f32 1.442695, %v1090_v9  ;;  %v1451_v52 = vadd.f32 -1.0, %v1152_v53 }
 0x316   : > { %v1822_v50 = vpop.eup %1821  ;;  %v1209_v15 = vmul.f32 %v1820_v37, %v1444_v60  ;;  %1833 = vpow2.f32 %v1117_v33  ;;  %v1066_v11 = vpop.f32.mrb[29].mxu0  ;;  %v2329_v26 = vadd.f32 %v1593_v45, %v2278_v39  ;;  %v1449_v48 = vadd.f32 -1.0, %v1150_v35 }
 0x317   : > { %v1824_v12 = vpop.eup %1823  ;;  %v1212_v21 = vmul.f32 %v1822_v50, %v1447_v10  ;;  %1835 = vpow2.f32 %v1113_v4  ;;  %v1594_v28 = vpop.f32.mrb[30].mxu0  ;;  %v1227_v2 = vmul.f32 %v1211_v43, %v2281_v47  ;;  %v2335_v0 = vadd.f32 %v2278_v39, %v1066_v11 }
 0x318   : > { %v1210_v29 = vmul.f32 %v1824_v12, %v1445_v38  ;;  %v1069_v20 = vpop.f32.mrb[31].mxu0  ;;  %v1095_v25 = vmin.f32 %v2329_v26, 20.0  ;;  %v2338_v22 = vadd.f32 %v1594_v28, %v2278_v39  ;;  %v1225_v32 = vmul.f32 %v1209_v15, %v2284_v61 }
 0x319   : > { %v1228_v17 = vmul.f32 %v1212_v21, %v2288_v49  ;;  %1837 = vpow2.f32 %v1119_v51  ;;  %v2343_v47 = vadd.f32 %v2278_v39, %v1069_v20  ;;  %v1093_v49 = vmin.f32 %v2335_v0, 20.0 }
 0x31a   : > { %v1226_v34 = vmul.f32 %v1210_v29, %v2292_v58  ;;  %1839 = vpow2.f32 %v1115_v56  ;;  %v1125_v36 = vmul.f32 1.442695, %v1095_v25  ;;  %v1096_v63 = vmin.f32 %v2338_v22, 20.0 }
 0x31b   : > { %v1242_v18 = vpack.c.bf16 %v1228_v17, %v1227_v2  ;;  %v1094_v6 = vmin.f32 %v2343_v47, 20.0  ;;  %v1121_v58 = vmul.f32 1.442695, %v1093_v49 }
 0x31c   : > { %v1826_v41 = vpop.eup %1825  ;;  %v1241_v23 = vpack.c.bf16 %v1226_v34, %v1225_v32  ;;  %1841 = vpow2.f32 %v1125_v36  ;;  %v1127_v54 = vmul.f32 1.442695, %v1096_v63 }
 0x31d   : > { %v1828_v1 = vpop.eup %1827  ;;  %v1215_v61 = vmul.f32 %v1826_v41, %v1450_v16  ;;  %v1123_v57 = vmul.f32 1.442695, %v1094_v6  ;;  %1843 = vpow2.f32 %v1121_v58 }
 0x31e   : > { %v1830_v44 = vpop.eup %1829  ;;  %v1213_v39 = vmul.f32 %v1828_v1, %v1448_v42  ;;  %1596 = vmatpush3.bf16.xpose.msra.mxu1 %v1241_v23  ;;  %1845 = vpow2.f32 %v1127_v54 }
 0x31f   : > { %v1832_v40 = vpop.eup %1831  ;;  %v1216_v55 = vmul.f32 %v1830_v44, %v1451_v52  ;;  %1597 = vmatprep.subr.bf16.mxu1 %v1929_v30  ;;  %v1231_v59 = vmul.f32 %v1215_v61, %v2297_v13  ;;  %1847 = vpow2.f32 %v1123_v57 }
 0x320   : > { %v1834_v46 = vpop.eup %1833  ;;  %v1214_v33 = vmul.f32 %v1832_v40, %v1449_v48  ;;  %v1229_v35 = vmul.f32 %v1213_v39, %v2300_v27 }
 0x321   : > { %v1836_v62 = vpop.eup %1835  ;;  %v1232_v53 = vmul.f32 %v1216_v55, %v2304_v3  ;;  %v1139_v4 = vadd.f32 1.0, %v1834_v46 }
 0x322   : > { %v1230_v31 = vmul.f32 %v1214_v33, %v2308_v5  ;;  %v1137_v60 = vadd.f32 1.0, %v1836_v62 }
 0x323   : > { %v1244_v37 = vpack.c.bf16 %v1232_v53, %v1231_v59  ;;  %v1155_v43 = vmul.f32 %v1139_v4, %v1139_v4  ;;  %v1838_v10 = vpop.eup %1837 }
 0x324   : > { %v1243_v38 = vpack.c.bf16 %v1230_v31, %v1229_v35  ;;  %v1153_v45 = vmul.f32 %v1137_v60, %v1137_v60  ;;  %v1840_v50 = vpop.eup %1839  ;;  %v1140_v7 = vadd.f32 1.0, %v1838_v10 }
 0x325   : > { %v1187_v15 = vadd.f32 1.0, %v1155_v43  ;;  %v1138_v11 = vadd.f32 1.0, %v1840_v50  ;;  %v1454_v42 = vadd.f32 -1.0, %v1155_v43 }
 0x326   : > { %v1185_v9 = vadd.f32 1.0, %v1153_v45  ;;  %1598 = vmatpush3.bf16.xpose.msra.mxu1 %v1242_v18  ;;  %v1842_v13 = vpop.eup %1841  ;;  %v1156_v3 = vmul.f32 %v1140_v7, %v1140_v7  ;;  %v1452_v63 = vadd.f32 -1.0, %v1153_v45 }
 0x327   : > { %1849 = vrcp.f32 %v1187_v15  ;;  %1599 = vmatprep.subr.bf16.mxu1 %v1929_v30  ;;  %v1154_v27 = vmul.f32 %v1138_v11, %v1138_v11  ;;  %v1143_v5 = vadd.f32 1.0, %v1842_v13  ;;  %v1844_v12 = vpop.eup %1843 }
 0x328   : > { %1851 = vrcp.f32 %v1185_v9  ;;  %v1188_v21 = vadd.f32 1.0, %v1156_v3  ;;  %v1846_v16 = vpop.eup %1845  ;;  %v1141_v29 = vadd.f32 1.0, %v1844_v12  ;;  %v1455_v1 = vadd.f32 -1.0, %v1156_v3 }
 0x329   : > { %v1186_v28 = vadd.f32 1.0, %v1154_v27  ;;  %v1159_v2 = vmul.f32 %v1143_v5, %v1143_v5  ;;  %v1848_v51 = vpop.eup %1847  ;;  %v1144_v56 = vadd.f32 1.0, %v1846_v16  ;;  %v1453_v58 = vadd.f32 -1.0, %v1154_v27 }
 0x32a   : > { %1853 = vrcp.f32 %v1188_v21  ;;  %v1157_v17 = vmul.f32 %v1141_v29, %v1141_v29  ;;  %v1142_v32 = vadd.f32 1.0, %v1848_v51 }
 0x32b   : > { %1855 = vrcp.f32 %v1186_v28  ;;  %v1191_v20 = vadd.f32 1.0, %v1159_v2  ;;  %v1160_v25 = vmul.f32 %v1144_v56, %v1144_v56  ;;  %v1458_v55 = vadd.f32 -1.0, %v1159_v2 }
 0x32c   : > { %v1189_v34 = vadd.f32 1.0, %v1157_v17  ;;  %v1158_v36 = vmul.f32 %v1142_v32, %v1142_v32  ;;  %v1456_v4 = vadd.f32 -1.0, %v1157_v17 }
 0x32d   : > { %1857 = vrcp.f32 %v1191_v20  ;;  %v1192_v18 = vadd.f32 1.0, %v1160_v25  ;;  %v1459_v35 = vadd.f32 -1.0, %v1160_v25 }
 0x32e   : > { %1600 = vmatpush3.bf16.xpose.msra.mxu1 %v1243_v38  ;;  %1859 = vrcp.f32 %v1189_v34  ;;  %v1190_v41 = vadd.f32 1.0, %v1158_v36  ;;  %v1457_v10 = vadd.f32 -1.0, %v1158_v36 }
 0x32f   : > { %1601 = vmatprep.subr.bf16.mxu1 %v1929_v30  ;;  %1861 = vrcp.f32 %v1192_v18 }
 0x330   : > { %1863 = vrcp.f32 %v1190_v41 }
 0x331   : > { %v1850_v49 = vpop.eup %1849 }
 0x332   : > { %v1852_v23 = vpop.eup %1851  ;;  %v1219_v6 = vmul.f32 %v1850_v49, %v1454_v42 }
 0x333   : > { %v1217_v52 = vmul.f32 %v1852_v23, %v1452_v63 }
 0x334   : > { %v1854_v61 = vpop.eup %1853  ;;  %v1235_v57 = vmul.f32 %v1219_v6, %v2313_v24 }
 0x335   : > { %v1856_v44 = vpop.eup %1855  ;;  %v1220_v39 = vmul.f32 %v1854_v61, %v1455_v1  ;;  %v1233_v46 = vmul.f32 %v1217_v52, %v2316_v14 }
 0x336   : > { %1602 = vmatpush3.bf16.xpose.msra.mxu1 %v1244_v37  ;;  %v1218_v48 = vmul.f32 %v1856_v44, %v1453_v58 }
 0x337   : > { %1603 = vmatprep.subr.bf16.mxu1 %v1929_v30  ;;  %v1858_v54 = vpop.eup %1857  ;;  %v1236_v40 = vmul.f32 %v1220_v39, %v2321_v8 }
 0x338   : > { %v1234_v33 = vmul.f32 %v1218_v48, %v2324_v19  ;;  %v1860_v62 = vpop.eup %1859  ;;  %v1223_v53 = vmul.f32 %v1858_v54, %v1458_v55 }
 0x339   : > { %v1246_v59 = vpack.c.bf16 %v1236_v40, %v1235_v57  ;;  %v1862_v31 = vpop.eup %1861  ;;  %v1221_v37 = vmul.f32 %v1860_v62, %v1456_v4 }
 0x33a   : > { %v1245_v60 = vpack.c.bf16 %v1234_v33, %v1233_v46  ;;  %v1224_v43 = vmul.f32 %v1862_v31, %v1459_v35  ;;  %v1864_v38 = vpop.eup %1863  ;;  %v1239_v24 = vmul.f32 %v1223_v53, %v2329_v26  ;;  %v1249_v26 = vld [vmem:[%s2421_s4] sm:$0xf] }
 0x33b   : > { %v1222_v45 = vmul.f32 %v1864_v38, %v1457_v10  ;;  %v1237_v14 = vmul.f32 %v1221_v37, %v2335_v0  ;;  %v1291_v0 = vstv %s1290_s30 }
 0x33c   : > { %v1240_v8 = vmul.f32 %v1224_v43, %v2338_v22 }
 0x33d   : > { %v1238_v50 = vmul.f32 %v1222_v45, %v2343_v47 }
 0x33e   : > { %1604 = vmatpush3.bf16.xpose.msra.mxu1 %v1245_v60  ;;  %v1248_v19 = vpack.c.bf16 %v1240_v8, %v1239_v24 }
 0x33f   : > { %1605 = vmatprep.subr.bf16.mxu1 %v1929_v30  ;;  %v1247_v15 = vpack.c.bf16 %v1238_v50, %v1237_v14 }
 0x346   : > { %1606 = vmatpush3.bf16.xpose.msra.mxu1 %v1246_v59 }
 0x347   : > { %1607 = vmatprep.subr.bf16.mxu1 %v1929_v30 }
 0x34e   : > { %1608 = vmatpush3.bf16.xpose.msra.mxu1 %v1247_v15 }
 0x34f   : > { %1609 = vmatprep.subr.bf16.mxu1 %v1929_v30 }
 0x356   : > { %1610 = vmatpush3.bf16.xpose.msra.mxu1 %v1248_v19 }
 0x35d   : > { %1612 = vmatmul.mubr.bf16.vlgmr.msra.gmra.mrb[16].mxu1 %v1249_v26 }
 0x430   : > { %v1284_v22 = vpop.f32.mrb[16].mxu1 }
 0x431   : > { %v1292_v47 = vadd.f32 %v1291_v0, %v1284_v22  ;;  %v1613_v7 = vpop.f32.mrb[17].mxu1 }
 0x432   : > { %v1287_v30 = vpop.f32.mrb[18].mxu1 }
 0x433   : > { %1293 = vst [vmem:[%s245_s11] sm:$0x1] %v1292_v47  ;;  %v1614_v9 = vpop.f32.mrb[19].mxu1 }
 0x434   : > { %1878 = shalt.err (!%p1875_p3)
}
 0x435   : > { %s1879_s12 = scalar_lea.hbm %s2375_s16, 16  ;;  %s1883_s27 = scalar_lea.hbm %s2423_s6, 32 }
 0x436   : > { %p1880_p4 = scmp.ne.s32.totalorder %s2375_s16, %s1879_s12  ;;  %p1884_p9 = scmp.lt.u32.totalorder %s2375_s16, %s2423_s6 }
 0x437   : > { %p1885_p10 = scmp.lt.u32.totalorder %s1883_s27, %s1879_s12  ;;  %p1887_p12 = scmp.lt.u32.totalorder %s1879_s12, %s2375_s16 }
 0x438   : > { %p1881_p7 = pnand %p1880_p4, %p2005_p5 }
 0x439   : > { %p1886_p11 = por %p1885_p10, %p1884_p9 }
 0x43a   : > { %p1882_p8 = pneg %p1881_p7 }
 0x43b   : > { %p1888_p13 = por %p1887_p12, %p1886_p11 }
 0x43d   : > { %p1889_p0 = pnand %p1888_p13, %p1882_p8 }
 0x43f   : > { %1892 = shalt.err (!%p1889_p0)
}
 0x440   : > { %1615 = dma.vmem_to_hbm [thread:$0]  (%p2005_p5), %s2377_s13, 16, %s2375_s16, %s1295_s17  }
 0x441 PF: > { %p1621_p1 = scmp.ge.s32.totalorder %s1927_s26, 2  ;;  %s1319_s10 = sand.u32 1, %s1915_s23  }
 0x442   : > { %s1320_s11 = scalar_lea.sflag [#allocation4], %s1319_s10 }
 0x443   : > { %p1618_p2 = pnand %p1621_p1, %p2009_p6 }
 0x445   : > { %1910 = dma.done.wait (!%p1618_p2), %s1320_s11, 16  }
 0x446   : > { %1912 = vsyncadd (!%p1618_p2), %s1320_s11, 4294967280  ;;  %p17_p3 = scmp.ge.s32.totalorder %s1993_s28, 4   ;;  %s2426_s23 = smov %s1919_s24 }
 0x447   : > { %s2427_s24 = smov %s1923_s25  ;;  %s2428_s25 = smov %s2003_s7 }
 0x448   : > { %s2429_s26 = smov %s1993_s28  ;;  %19 = sbr.rel (!%p17_p3) target bundleno = 5 (0x5), region = 80 }
 0x44f   :  { %1324 = vsyncpa [#allocation4], 1 }
 0x450   :  { %1326 = vsyncpa [#allocation4 + $0x1], 1 }

</bundles_post_ra>
